<compile_context>
chip_gen: v7x
topology: tpu7x:2x2x1
jax: 0.10.0
libtpu: 0.0.40
codegen_flags: <defaults>
</compile_context>

<pallas_src>
import functools

import jax
import jax.numpy as jnp
from jax.experimental import pallas as pl
from jax.experimental.pallas import tpu as pltpu


def _feature_index_lists(cg, num_pow):
    """Monomial ordering identical to the PyTorch forward loops (per group)."""
    singles, pairs, triples = [], [], []
    if 1 in num_pow:
        singles = [(c,) for c in range(cg)]
    if 2 in num_pow:
        pairs = [(c1, c2) for c1 in range(cg) for c2 in range(c1, cg)]
    if 3 in num_pow:
        triples = [(c1, c2, c3)
                   for c1 in range(cg)
                   for c2 in range(c1, cg)
                   for c3 in range(c2, cg)]
    return singles + pairs + triples


def _pick_tiling(sr, cg, budget_bytes=16 << 20, tr_cap=4096):
    """Pick (tile_rows, padded_rows, chunk_rows).

    chunk_rows (rc): rows per in-register compute chunk -- the live set
      (cg inputs + a few Horner temporaries) must fit in vregs.
    tile_rows (tr): rows per DMA block -- as big as a conservative VMEM
      budget allows (double-buffered in+out), multiple of rc, balanced over
      the row-tile grid axis so padding stays negligible.
    """
    if cg <= 8:
        rc = 32
    elif cg <= 16:
        rc = 16
    else:
        rc = 8
    if sr <= rc:
        return sr, sr, sr                       # single tiny block, one chunk

    # double-buffered input + output blocks per row-of-128, plus slack
    per_row_bytes = 4 * cg * 128 * 4 + 1024
    tr_max = max(rc, min(budget_bytes // per_row_bytes, tr_cap))
    tr_max = (tr_max // rc) * rc

    if sr <= tr_max:
        sr_pad = pl.cdiv(sr, rc) * rc           # one full-extent row tile
        return sr_pad, sr_pad, rc

    num_t = pl.cdiv(sr, tr_max)                 # balanced tiles -> tiny padding
    tr = pl.cdiv(pl.cdiv(sr, num_t), rc) * rc
    sr_pad = tr * num_t
    return tr, sr_pad, rc


def hoaf_kernel(x_ref, w_ref, b_ref, o_ref, *, cg, f_tot, num_pow, rc):
    # x_ref / o_ref block: (1, 1, cg, TR, 128) -- one group's channels, each a
    #   dense (TR, 128) spatial slab.
    # w_ref: (G, cg * f_tot) f32 in SMEM; b_ref: (G, cg) f32 in SMEM.
    g = pl.program_id(0)
    tr = x_ref.shape[3]
    n_chunks = tr // rc

    feat_list = _feature_index_lists(cg, num_pow)
    assert len(feat_list) == f_tot and f_tot > 0
    pos = {idx: i for i, idx in enumerate(feat_list)}

    # Hoist every per-group weight/bias scalar out of the chunk loop.
    wsc = [{idx: w_ref[g, c * f_tot + pos[idx]] for idx in feat_list}
           for c in range(cg)]
    bsc = [b_ref[g, c] for c in range(cg)]

    def chunk(r0):
        # (rc, 128) register-resident chunks of every input channel.
        xs = [x_ref[0, 0, c, pl.ds(r0, rc), :] for c in range(cg)]
        for c in range(cg):
            acc = None
            for i in range(cg):
                # Horner: monomials whose smallest channel index is i.
                s = wsc[c][(i,)] if 1 in num_pow else None
                if (2 in num_pow) or (3 in num_pow):
                    for j in range(i, cg):
                        t = wsc[c][(i, j)] if 2 in num_pow else None
                        if 3 in num_pow:
                            for k in range(j, cg):
                                term = xs[k] * wsc[c][(i, j, k)]
                                t = term if t is None else t + term
                        contrib = xs[j] * t
                        s = contrib if s is None else s + contrib
                term_i = xs[i] * s
                acc = term_i if acc is None else acc + term_i
            acc = acc + bsc[c]
            o_ref[0, 0, c, pl.ds(r0, rc), :] = acc.astype(o_ref.dtype)

    if n_chunks == 1:
        chunk(0)
    else:
        @pl.loop(0, n_chunks)
        def _(ci):
            chunk(pl.multiple_of(ci * rc, rc))


def hoaf_forward(x, w_all, b_all, *, num_groups, num_pow):
    """x: (B, C, H, W) float32; w_all: (G, Cg, F_tot); b_all: (G, Cg)."""
    B, C, H, W = x.shape
    G = num_groups
    cg = C // G
    f_tot = w_all.shape[-1]
    S = H * W

    # Lane-dense spatial layout: pad spatial to the tile grid and view it as
    # (rows, 128).  Padded positions are zeros and are sliced away below;
    # the pad copy only happens when S itself needs padding.
    sr = pl.cdiv(S, 128)
    tr, sr_pad, rc = _pick_tiling(sr, cg)
    s_pad = sr_pad * 128

    xg = x.reshape(B, G, cg, S)
    if s_pad != S:
        xg = jnp.pad(xg, ((0, 0), (0, 0), (0, 0), (0, s_pad - S)))
    xg = xg.reshape(B, G, cg, sr_pad, 128)

    # Weights / bias flattened for SMEM scalar reads inside the kernel.
    w2 = w_all.reshape(G, cg * f_tot).astype(jnp.float32)
    b2 = b_all.reshape(G, cg).astype(jnp.float32)

    num_t = sr_pad // tr
    kern = functools.partial(hoaf_kernel, cg=cg, f_tot=f_tot,
                             num_pow=tuple(num_pow), rc=rc)

    out = pl.pallas_call(
        kern,
        out_shape=jax.ShapeDtypeStruct((B, G, cg, sr_pad, 128), x.dtype),
        grid=(G, B, num_t),
        in_specs=[
            pl.BlockSpec((1, 1, cg, tr, 128), lambda g, b, t: (b, g, 0, t, 0)),
            pl.BlockSpec(memory_space=pltpu.MemorySpace.SMEM),
            pl.BlockSpec(memory_space=pltpu.MemorySpace.SMEM),
        ],
        out_specs=pl.BlockSpec((1, 1, cg, tr, 128),
                               lambda g, b, t: (b, g, 0, t, 0)),
        compiler_params=pltpu.CompilerParams(
            dimension_semantics=("parallel", "parallel", "parallel"),
            vmem_limit_bytes=32 * 1024 * 1024),
    )(xg, w2, b2)

    out = out.reshape(B, G, cg, s_pad)[..., :S]
    return out.reshape(B, C, H, W)


def init_hoaf_params(key, num_groups, num_channels, num_pow):
    """Deterministic synthetic weights for conv1/conv2/conv3, combined.

    Each conv_p is a grouped 1x1 conv: weight (C, f_p, 1, 1), bias (C,).
    Since the forward sums the three conv outputs, they collapse into one
    per-group linear: W_all (G, Cg, F_tot) over concatenated monomial
    features, bias = b1 + b2 + b3.
    """
    cg = num_channels // num_groups
    f1 = cg
    f2 = cg * (cg + 1) // 2
    f3 = sum((i + 1) * (i + 2) // 2 for i in range(cg))

    keys = jax.random.split(key, 6)
    specs = []
    if 1 in num_pow:
        specs.append((f1, keys[0], keys[1]))
    if 2 in num_pow:
        specs.append((f2, keys[2], keys[3]))
    if 3 in num_pow:
        specs.append((f3, keys[4], keys[5]))

    w_blocks = []
    b_total = jnp.zeros((num_groups, cg), jnp.float32)
    for fp, kw, kb in specs:
        w = jax.random.normal(kw, (num_channels, fp), jnp.float32) * 0.1
        b = jax.random.normal(kb, (num_channels,), jnp.float32) * 0.1
        w_blocks.append(w.reshape(num_groups, cg, fp))
        b_total = b_total + b.reshape(num_groups, cg)
    w_all = jnp.concatenate(w_blocks, axis=-1)   # (G, cg, F_tot)
    return w_all, b_total


def hoaf_reference(x, w_all, b_all, num_groups, num_pow):
    """Pure-JAX mirror of the PyTorch forward (for validation)."""
    B, C, H, W = x.shape
    cg = C // num_groups
    xg = x.reshape(B, num_groups, cg, H * W)
    rows = []
    for idx in _feature_index_lists(cg, tuple(num_pow)):
        r = xg[:, :, idx[0], :]
        for c in idx[1:]:
            r = r * xg[:, :, c, :]
        rows.append(r)
    f = jnp.stack(rows, axis=2)                              # (B, G, F_tot, S)
    out = jnp.einsum('gcf,bgfs->bgcs', w_all, f) + b_all[None, :, :, None]
    return out.reshape(B, C, H, W)


if __name__ == "__main__":
    num_groups = 2
    num_channels = 4
    num_pow = (1, 2, 3)
    B, H, W = 2, 16, 16

    key = jax.random.PRNGKey(0)
    kx, kp = jax.random.split(key)
    x = jax.random.normal(kx, (B, num_channels, H, W), jnp.float32)
    w_all, b_all = init_hoaf_params(kp, num_groups, num_channels, num_pow)

    out = hoaf_forward(x, w_all, b_all, num_groups=num_groups, num_pow=num_pow)
    out = jax.block_until_ready(out)

    ref = hoaf_reference(x, w_all, b_all, num_groups, num_pow)
    assert out.shape == (B, num_channels, H, W)
    assert jnp.allclose(out, ref, atol=1e-5, rtol=1e-5)
    print("KERNEL_OK")
</pallas_src>

<mosaic_0001>
module attributes {stable_mosaic.version = 11 : i64} {
  func.func @hoaf_kernel(%arg0: i32, %arg1: i32, %arg2: i32, %arg3: memref<1x1x2x2x128xf32, #tpu.memory_space<vmem>>, %arg4: memref<2x18xf32, #tpu.memory_space<smem>>, %arg5: memref<2x2xf32, #tpu.memory_space<smem>>, %arg6: memref<1x1x2x2x128xf32, #tpu.memory_space<vmem>>) attributes {dimension_semantics = [#tpu.dimension_semantics<parallel>, #tpu.dimension_semantics<parallel>, #tpu.dimension_semantics<parallel>], iteration_bounds = array<i64: 2, 2, 1>, scalar_prefetch = 0 : i64, scratch_operands = 0 : i64, tpu.core_type = #tpu.core_type<tc>, window_params = [{transform_indices = @transform_0, window_bounds = array<i64: 1, 1, 2, 2, 128>}, {transform_indices = @transform_1, window_bounds = array<i64: 2, 18>}, {transform_indices = @transform_2, window_bounds = array<i64: 2, 2>}, {transform_indices = @transform_3, window_bounds = array<i64: 1, 1, 2, 2, 128>}]} {
    %0 = arith.index_cast %arg0 : i32 to index
    %c0 = arith.constant 0 : index
    %1 = memref.load %arg4[%0, %c0] : memref<2x18xf32, #tpu.memory_space<smem>>
    %2 = arith.index_cast %arg0 : i32 to index
    %c1 = arith.constant 1 : index
    %3 = memref.load %arg4[%2, %c1] : memref<2x18xf32, #tpu.memory_space<smem>>
    %4 = arith.index_cast %arg0 : i32 to index
    %c2 = arith.constant 2 : index
    %5 = memref.load %arg4[%4, %c2] : memref<2x18xf32, #tpu.memory_space<smem>>
    %6 = arith.index_cast %arg0 : i32 to index
    %c3 = arith.constant 3 : index
    %7 = memref.load %arg4[%6, %c3] : memref<2x18xf32, #tpu.memory_space<smem>>
    %8 = arith.index_cast %arg0 : i32 to index
    %c4 = arith.constant 4 : index
    %9 = memref.load %arg4[%8, %c4] : memref<2x18xf32, #tpu.memory_space<smem>>
    %10 = arith.index_cast %arg0 : i32 to index
    %c5 = arith.constant 5 : index
    %11 = memref.load %arg4[%10, %c5] : memref<2x18xf32, #tpu.memory_space<smem>>
    %12 = arith.index_cast %arg0 : i32 to index
    %c6 = arith.constant 6 : index
    %13 = memref.load %arg4[%12, %c6] : memref<2x18xf32, #tpu.memory_space<smem>>
    %14 = arith.index_cast %arg0 : i32 to index
    %c7 = arith.constant 7 : index
    %15 = memref.load %arg4[%14, %c7] : memref<2x18xf32, #tpu.memory_space<smem>>
    %16 = arith.index_cast %arg0 : i32 to index
    %c8 = arith.constant 8 : index
    %17 = memref.load %arg4[%16, %c8] : memref<2x18xf32, #tpu.memory_space<smem>>
    %18 = arith.index_cast %arg0 : i32 to index
    %c9 = arith.constant 9 : index
    %19 = memref.load %arg4[%18, %c9] : memref<2x18xf32, #tpu.memory_space<smem>>
    %20 = arith.index_cast %arg0 : i32 to index
    %c10 = arith.constant 10 : index
    %21 = memref.load %arg4[%20, %c10] : memref<2x18xf32, #tpu.memory_space<smem>>
    %22 = arith.index_cast %arg0 : i32 to index
    %c11 = arith.constant 11 : index
    %23 = memref.load %arg4[%22, %c11] : memref<2x18xf32, #tpu.memory_space<smem>>
    %24 = arith.index_cast %arg0 : i32 to index
    %c12 = arith.constant 12 : index
    %25 = memref.load %arg4[%24, %c12] : memref<2x18xf32, #tpu.memory_space<smem>>
    %26 = arith.index_cast %arg0 : i32 to index
    %c13 = arith.constant 13 : index
    %27 = memref.load %arg4[%26, %c13] : memref<2x18xf32, #tpu.memory_space<smem>>
    %28 = arith.index_cast %arg0 : i32 to index
    %c14 = arith.constant 14 : index
    %29 = memref.load %arg4[%28, %c14] : memref<2x18xf32, #tpu.memory_space<smem>>
    %30 = arith.index_cast %arg0 : i32 to index
    %c15 = arith.constant 15 : index
    %31 = memref.load %arg4[%30, %c15] : memref<2x18xf32, #tpu.memory_space<smem>>
    %32 = arith.index_cast %arg0 : i32 to index
    %c16 = arith.constant 16 : index
    %33 = memref.load %arg4[%32, %c16] : memref<2x18xf32, #tpu.memory_space<smem>>
    %34 = arith.index_cast %arg0 : i32 to index
    %c17 = arith.constant 17 : index
    %35 = memref.load %arg4[%34, %c17] : memref<2x18xf32, #tpu.memory_space<smem>>
    %36 = arith.index_cast %arg0 : i32 to index
    %c0_0 = arith.constant 0 : index
    %37 = memref.load %arg5[%36, %c0_0] : memref<2x2xf32, #tpu.memory_space<smem>>
    %38 = arith.index_cast %arg0 : i32 to index
    %c1_1 = arith.constant 1 : index
    %39 = memref.load %arg5[%38, %c1_1] : memref<2x2xf32, #tpu.memory_space<smem>>
    %c0_2 = arith.constant 0 : index
    %c0_3 = arith.constant 0 : index
    %c0_4 = arith.constant 0 : index
    %c0_5 = arith.constant 0 : index
    %c0_6 = arith.constant 0 : index
    %40 = vector.load %arg3[%c0_2, %c0_3, %c0_4, %c0_5, %c0_6] : memref<1x1x2x2x128xf32, #tpu.memory_space<vmem>>, vector<1x1x1x2x128xf32>
    %41 = vector.shape_cast %40 : vector<1x1x1x2x128xf32> to vector<2x128xf32>
    %c0_7 = arith.constant 0 : index
    %c0_8 = arith.constant 0 : index
    %c1_9 = arith.constant 1 : index
    %c0_10 = arith.constant 0 : index
    %c0_11 = arith.constant 0 : index
    %42 = vector.load %arg3[%c0_7, %c0_8, %c1_9, %c0_10, %c0_11] : memref<1x1x2x2x128xf32, #tpu.memory_space<vmem>>, vector<1x1x1x2x128xf32>
    %43 = vector.shape_cast %42 : vector<1x1x1x2x128xf32> to vector<2x128xf32>
    %44 = vector.broadcast %11 : f32 to vector<2x128xf32>
    %45 = arith.mulf %41, %44 : vector<2x128xf32>
    %46 = vector.broadcast %5 : f32 to vector<2x128xf32>
    %47 = arith.addf %46, %45 : vector<2x128xf32>
    %48 = vector.broadcast %13 : f32 to vector<2x128xf32>
    %49 = arith.mulf %43, %48 : vector<2x128xf32>
    %50 = arith.addf %47, %49 : vector<2x128xf32>
    %51 = arith.mulf %41, %50 : vector<2x128xf32>
    %52 = vector.broadcast %1 : f32 to vector<2x128xf32>
    %53 = arith.addf %52, %51 : vector<2x128xf32>
    %54 = vector.broadcast %15 : f32 to vector<2x128xf32>
    %55 = arith.mulf %43, %54 : vector<2x128xf32>
    %56 = vector.broadcast %7 : f32 to vector<2x128xf32>
    %57 = arith.addf %56, %55 : vector<2x128xf32>
    %58 = arith.mulf %43, %57 : vector<2x128xf32>
    %59 = arith.addf %53, %58 : vector<2x128xf32>
    %60 = arith.mulf %41, %59 : vector<2x128xf32>
    %61 = vector.broadcast %17 : f32 to vector<2x128xf32>
    %62 = arith.mulf %43, %61 : vector<2x128xf32>
    %63 = vector.broadcast %9 : f32 to vector<2x128xf32>
    %64 = arith.addf %63, %62 : vector<2x128xf32>
    %65 = arith.mulf %43, %64 : vector<2x128xf32>
    %66 = vector.broadcast %3 : f32 to vector<2x128xf32>
    %67 = arith.addf %66, %65 : vector<2x128xf32>
    %68 = arith.mulf %43, %67 : vector<2x128xf32>
    %69 = arith.addf %60, %68 : vector<2x128xf32>
    %70 = vector.broadcast %37 : f32 to vector<2x128xf32>
    %71 = arith.addf %69, %70 : vector<2x128xf32>
    %c0_12 = arith.constant 0 : index
    %c0_13 = arith.constant 0 : index
    %c0_14 = arith.constant 0 : index
    %c0_15 = arith.constant 0 : index
    %c0_16 = arith.constant 0 : index
    %72 = vector.load %arg6[%c0_12, %c0_13, %c0_14, %c0_15, %c0_16] : memref<1x1x2x2x128xf32, #tpu.memory_space<vmem>>, vector<1x1x1x2x128xf32>
    %73 = vector.shape_cast %72 : vector<1x1x1x2x128xf32> to vector<2x128xf32>
    %74 = vector.shape_cast %71 : vector<2x128xf32> to vector<1x1x1x2x128xf32>
    tpu.vector_store %arg6[%c0_12, %c0_13, %c0_14, %c0_15, %c0_16], %74 {strides = array<i32>} : memref<1x1x2x2x128xf32, #tpu.memory_space<vmem>>, vector<1x1x1x2x128xf32>,
    %75 = vector.broadcast %29 : f32 to vector<2x128xf32>
    %76 = arith.mulf %41, %75 : vector<2x128xf32>
    %77 = vector.broadcast %23 : f32 to vector<2x128xf32>
    %78 = arith.addf %77, %76 : vector<2x128xf32>
    %79 = vector.broadcast %31 : f32 to vector<2x128xf32>
    %80 = arith.mulf %43, %79 : vector<2x128xf32>
    %81 = arith.addf %78, %80 : vector<2x128xf32>
    %82 = arith.mulf %41, %81 : vector<2x128xf32>
    %83 = vector.broadcast %19 : f32 to vector<2x128xf32>
    %84 = arith.addf %83, %82 : vector<2x128xf32>
    %85 = vector.broadcast %33 : f32 to vector<2x128xf32>
    %86 = arith.mulf %43, %85 : vector<2x128xf32>
    %87 = vector.broadcast %25 : f32 to vector<2x128xf32>
    %88 = arith.addf %87, %86 : vector<2x128xf32>
    %89 = arith.mulf %43, %88 : vector<2x128xf32>
    %90 = arith.addf %84, %89 : vector<2x128xf32>
    %91 = arith.mulf %41, %90 : vector<2x128xf32>
    %92 = vector.broadcast %35 : f32 to vector<2x128xf32>
    %93 = arith.mulf %43, %92 : vector<2x128xf32>
    %94 = vector.broadcast %27 : f32 to vector<2x128xf32>
    %95 = arith.addf %94, %93 : vector<2x128xf32>
    %96 = arith.mulf %43, %95 : vector<2x128xf32>
    %97 = vector.broadcast %21 : f32 to vector<2x128xf32>
    %98 = arith.addf %97, %96 : vector<2x128xf32>
    %99 = arith.mulf %43, %98 : vector<2x128xf32>
    %100 = arith.addf %91, %99 : vector<2x128xf32>
    %101 = vector.broadcast %39 : f32 to vector<2x128xf32>
    %102 = arith.addf %100, %101 : vector<2x128xf32>
    %c0_17 = arith.constant 0 : index
    %c0_18 = arith.constant 0 : index
    %c1_19 = arith.constant 1 : index
    %c0_20 = arith.constant 0 : index
    %c0_21 = arith.constant 0 : index
    %103 = vector.load %arg6[%c0_17, %c0_18, %c1_19, %c0_20, %c0_21] : memref<1x1x2x2x128xf32, #tpu.memory_space<vmem>>, vector<1x1x1x2x128xf32>
    %104 = vector.shape_cast %103 : vector<1x1x1x2x128xf32> to vector<2x128xf32>
    %105 = vector.shape_cast %102 : vector<2x128xf32> to vector<1x1x1x2x128xf32>
    tpu.vector_store %arg6[%c0_17, %c0_18, %c1_19, %c0_20, %c0_21], %105 {strides = array<i32>} : memref<1x1x2x2x128xf32, #tpu.memory_space<vmem>>, vector<1x1x1x2x128xf32>,
    return
  }
  func.func @transform_0(%arg0: i32, %arg1: i32, %arg2: i32) -> (i32, i32, i32, i32, i32) {
    %c0_i32 = arith.constant 0 : i32
    %c0_i32_0 = arith.constant 0 : i32
    %c0_i32_1 = arith.constant 0 : i32
    return %arg1, %arg0, %c0_i32, %arg2, %c0_i32_0 : i32, i32, i32, i32, i32
  }
  func.func @transform_1(%arg0: i32, %arg1: i32, %arg2: i32) -> (i32, i32) {
    %c0_i32 = arith.constant 0 : i32
    %c0_i32_0 = arith.constant 0 : i32
    %c0_i32_1 = arith.constant 0 : i32
    return %c0_i32, %c0_i32_0 : i32, i32
  }
  func.func @transform_2(%arg0: i32, %arg1: i32, %arg2: i32) -> (i32, i32) {
    %c0_i32 = arith.constant 0 : i32
    %c0_i32_0 = arith.constant 0 : i32
    %c0_i32_1 = arith.constant 0 : i32
    return %c0_i32, %c0_i32_0 : i32, i32
  }
  func.func @transform_3(%arg0: i32, %arg1: i32, %arg2: i32) -> (i32, i32, i32, i32, i32) {
    %c0_i32 = arith.constant 0 : i32
    %c0_i32_0 = arith.constant 0 : i32
    %c0_i32_1 = arith.constant 0 : i32
    return %arg1, %arg0, %c0_i32, %arg2, %c0_i32_0 : i32, i32, i32, i32, i32
  }
}

</mosaic_0001>

<bundles_post_ra>
// kernel: tpu_custom_call.1
= control target key start
LH: loop header
LB: loop body
LE: loop exit
PB: predicated region body
PF: predicated region fallthrough
CT: control target
= control target key end

     0   :  { %s1129_s0 = inlined_call_operand.hbm [shape: f32[2,2,2,2,128], index: 0, kind: input, shape index: {}]   ;;  %s1130_s1 = inlined_call_operand.vmem [shape: f32[2,18], index: 1, kind: input, shape index: {}]   ;;  %s1131_s2 = inlined_call_operand.vmem [shape: f32[2,2], index: 2, kind: input, shape index: {}]   ;;  %s1132_s3 = inlined_call_operand.hbm [shape: f32[2,2,2,2,128], index: 3, kind: output, shape index: {}]  }
   0x1   :  { %1143 = sst [smem:[#allocation16_spill]] %s1130_s1 }
   0x2   :  { %1144 = sst [smem:[#allocation17_spill]] %s1131_s2 }
   0x3   :  { %8 = vsyncpa [#allocation3], 0 }
   0x4   :  { %10 = vsyncpa [#allocation3 + $0x1], 0 }
   0x5   :  { %11 = vsyncpa [#allocation5], 0 }
   0x6   :  { %12 = vsyncpa [#allocation8], 0 }
   0x7   :  { %13 = vsyncpa [#allocation4], 0 }
   0x8   :  { %15 = vsyncpa [#allocation4 + $0x1], 0  ;;  %s803_s12 = smov 0   ;;  %s805_s13 = smov 0  }
   0x9   :  { %s807_s14 = smov 0   ;;  %s809_s15 = smov 0  }
   0xa   :  { %s811_s16 = smov 0   ;;  %s813_s17 = smov 0  }
   0xb   :  { %s815_s18 = smov 0   ;;  %s817_s19 = smov 0  }
   0xc LB: > { %1145 = sst [smem:[#allocation14_spill]] %s765_s17  ;;  %s480_s20 = sadd.s32 4294967295, %s773_s19   ;;  %s773_s19 = sphi %s817_s19, %s21_s19   ;;  %s769_s18 = sphi %s815_s18, %s1172_s18   ;;  %s765_s17 = sphi %s813_s17, %s1167_s17   ;;  %s761_s16 = sphi %s811_s16, %s1171_s16   ;;  %s757_s15 = sphi %s809_s15, %s1166_s15   ;;  %s753_s14 = sphi %s807_s14, %s1170_s14   ;;  %s749_s13 = sphi %s805_s13, %s1169_s13   ;;  %s745_s12 = sphi %s803_s12, %s1168_s12  }
   0xd   : > { %s481_s21 = sadd.s32 4294967294, %s773_s19   ;;  %p58_p0 = scmp.ne.s32.totalorder %s753_s14, %s749_s13 }
   0xe   : > { %p59_p1 = scmp.eq.s32.totalorder %s773_s19, 0  ;;  %p64_p2 = scmp.ne.s32.totalorder %s749_s13, %s745_s12 }
   0xf   : > { %p851_p3 = scmp.eq.s32.totalorder %s480_s20, 0  ;;  %p134_p4 = scmp.eq.s32.totalorder %s480_s20, 3 }
  0x10   : > { %p855_p5 = por %p59_p1, %p58_p0  ;;  %p140_p6 = scmp.eq.s32.totalorder %s481_s21, 3 }
  0x11   : > { %s1146_s23 = scalar_select %p851_p3, 1, 0 }
  0x12   : > { %p861_p7 = por %p851_p3, %p64_p2  ;;  %p865_p8 = por %p134_p4, %p58_p0 }
  0x13   : > { %p869_p9 = por %p140_p6, %p64_p2  ;;  %p482_p10 = scmp.ge.s32.totalorder %s773_s19, 1 }
  0x14   : > { %s1148_s25 = scalar_select %p861_p7, 1, 0 }
  0x15   : > { %s1149_s26 = scalar_select %p865_p8, 1, 0 }
  0x16   : > { %s1150_s27 = scalar_select %p869_p9, 1, 0 }
  0x17   : > { %p147_p11 = scmp.lt.s32.totalorder %s773_s19, 5  ;;  %s1151_s1 = sld [smem:[#allocation16_spill]] }
  0x18   : > { %p533_p13 = scmp.lt.s32.totalorder %s773_s19, 4  ;;  %s1153_s2 = sld [smem:[#allocation17_spill]] }
  0x19   : > { %p878_p12 = pnand %p482_p10, %p147_p11 }
  0x1a   : > { %p890_p1 = pnand %p533_p13, %p855_p5 }
  0x1b   : > { %s1152_s4 = scalar_select %p878_p12, 1, 0 }
  0x1c   : > { %p516_p0 = pneg %p878_p12 }
  0x1d   : > { %s160_s30 = sshll.u32 %s1151_s1, 4  ;;  %s161_s30 = int_to_ptr.vmem [resolvable:$true] %s160_s30 }
  0x1e   : > { %s171_s7 = sshll.u32 %s1153_s2, 4  ;;  %p896_p2 = pnand %p516_p0, %p851_p3  ;;  %s172_s7 = int_to_ptr.vmem [resolvable:$true] %s171_s7 }
  0x1f   : > { %s1154_s8 = scalar_select %p890_p1, 1, 0 }
  0x20   : > { %s607_s10 = scalar_lea.vmem %s161_s30, 32  ;;  %p609_p6 = pneg %p896_p2 }
  0x21   : > { %p608_p4 = scmp.ne.s32.totalorder %s161_s30, %s607_s10  ;;  %p615_p9 = scmp.lt.s32.totalorder %s161_s30, %s161_s30 }
  0x22   : > { %p616_p8 = scmp.lt.s32.totalorder %s607_s10, %s607_s10 }
  0x23   : > { %p610_p10 = pnand %p609_p6, %p608_p4 }
  0x24   : > { %p617_p7 = por %p616_p8, %p615_p9 }
  0x25   : > { %p611_p11 = pneg %p610_p10 }
  0x27   : > { %p618_p5 = pnand %p617_p7, %p611_p11 }
  0x29   : > { %621 = shalt.err (!%p618_p5)
}
  0x2a   : > { %s775_s11 = smov [#allocation6]   ;;  %s622_s20 = scalar_lea.vmem %s172_s7, 32 }
  0x2b   : > { %519 = dma.vmem_to_smem (!%p896_p2), %s161_s30, 32, %s775_s11, [#allocation5]  }
  0x2c   : > { %p623_p13 = scmp.ne.s32.totalorder %s172_s7, %s622_s20  ;;  %p630_p12 = scmp.lt.s32.totalorder %s172_s7, %s172_s7 }
  0x2d   : > { %p631_p1 = scmp.lt.s32.totalorder %s622_s20, %s622_s20 }
  0x2e   : > { %p625_p0 = pnand %p623_p13, %p609_p6 }
  0x2f   : > { %p632_p4 = por %p631_p1, %p630_p12 }
  0x30   : > { %p626_p3 = pneg %p625_p0 }
  0x32   : > { %p633_p10 = pnand %p632_p4, %p626_p3 }
  0x34   : > { %636 = shalt.err (!%p633_p10)
}
  0x35   : > { %s776_s21 = smov [#allocation7]   ;;  %s36_s24 = sadd.s32 1, %s765_s17 }
  0x36   : > { %522 = dma.vmem_to_smem (!%p896_p2), %s172_s7, 32, %s776_s21, [#allocation8]  }
  0x37   : > { %s40_s28 = sadd.s32 1, %s769_s18  ;;  %p38_p7 = scmp.ge.s32.totalorder %s36_s24, 2 }
  0x38   : > { %s182_s29 = sand.u32 1, %s753_s14   ;;  %s487_s6 = sshll.u32 %s769_s18, 1 }
  0x39   : > { %s486_s30 = sshll.u32 %s182_s29, 2  ;;  %s1174_s24 = smov (%p38_p7, %s36_s24), 0 }
  0x3a   : > { %1156 = sst [smem:[#allocation15_spill]] %s1174_s24  ;;  %s1176_s28 = smov (!%p38_p7, %s40_s28), %s769_s18 }
  0x3b   : > { %s44_s5 = ssub.s32 %s765_s17, %s1174_s24  ;;  %p42_p3 = scmp.ge.s32.totalorder %s1176_s28, 2 }
  0x3c   : > { %s488_s9 = sshll.u32 %s765_s17, 2  ;;  %s186_s10 = scalar_lea.vmem [#allocation2], %s486_s30 }
  0x3d   : > { %s196_s7 = sshll.u32 %s186_s10, 4  ;;  %s1178_s28 = smov (%p42_p3, %s1176_s28), 0  ;;  %s918_s7 = int_to_ptr.vmem [resolvable:$true] %s196_s7 }
  0x3e   : > { %s193_s11 = sadd.s32 %s488_s9, %s487_s6  ;;  %s45_s20 = ssub.s32 %s769_s18, %s1178_s28 }
  0x3f   : > { %s489_s21 = sshll.u32 %s193_s11, 5  ;;  %s46_s22 = sor.u32 %s45_s20, %s44_s5 }
  0x40   : > { %s925_s24 = scalar_lea.hbm %s1129_s0, %s489_s21  ;;  %p49_p8 = scmp.eq.s32.totalorder %s46_s22, 0 }
  0x41   : > { %s1157_s30 = sadd.s32 1, %s753_s14  ;;  %s932_s17 = scalar_lea.sflag [#allocation3], %s182_s29 }
  0x42   : > { %s930_s10 = scalar_select %p49_p8, %s753_s14, %s1157_s30  }
  0x43   : > { %s637_s6 = scalar_lea.hbm %s925_s24, 64  ;;  %p1158_p12 = scmp.ne.s32.totalorder %s1154_s8, 0 }
  0x44   : > { %p638_p9 = scmp.ne.s32.totalorder %s925_s24, %s637_s6  ;;  %s642_s5 = scalar_lea.hbm %s1129_s0, 256 }
  0x45   : > { %p639_p1 = pneg %p1158_p12  ;;  %p643_p11 = scmp.lt.u32.totalorder %s925_s24, %s1129_s0 }
  0x46   : > { %p644_p5 = scmp.lt.u32.totalorder %s642_s5, %s637_s6  ;;  %p646_p0 = scmp.lt.u32.totalorder %s637_s6, %s925_s24 }
  0x47   : > { %p640_p2 = pnand %p639_p1, %p638_p9 }
  0x48   : > { %p645_p13 = por %p644_p5, %p643_p11 }
  0x49   : > { %p641_p6 = pneg %p640_p2 }
  0x4a   : > { %p647_p4 = por %p646_p0, %p645_p13 }
  0x4c   : > { %p648_p10 = pnand %p647_p4, %p641_p6 }
  0x4e   : > { %651 = shalt.err (!%p648_p10)
}
  0x4f   : > { %s652_s22 = scalar_lea.vmem %s918_s7, 64  ;;  %s777_s29 = smov [#allocation2]  }
  0x50   : > { %p653_p7 = scmp.ne.s32.totalorder %s918_s7, %s652_s22  ;;  %s657_s20 = sshll.u32 %s777_s29, 4  ;;  %s658_s20 = int_to_ptr.vmem [resolvable:$false] %s657_s20 }
  0x51   : > { %s659_s21 = scalar_lea.vmem %s658_s20, 128  ;;  %p660_p9 = scmp.lt.s32.totalorder %s918_s7, %s658_s20 }
  0x52   : > { %p655_p3 = pnand %p653_p7, %p639_p1  ;;  %p661_p2 = scmp.lt.s32.totalorder %s659_s21, %s652_s22 }
  0x54   : > { %p656_p8 = pneg %p655_p3  ;;  %p662_p11 = por %p661_p2, %p660_p9 }
  0x56   : > { %p663_p5 = pnand %p662_p11, %p656_p8 }
  0x58   : > { %666 = shalt.err (!%p663_p5)
}
  0x59   : > { %s778_s30 = smov 32   ;;  %s779_s6 = smov 2  }
  0x5a   : > { %526 = dma.hbm_to_vmem [thread:$0]  (!%p1158_p12), %s925_s24, 64, %s918_s7, %s932_s17, %s778_s30, %s778_s30, %s779_s6  }
  0x5b   : > { %p1159_p1 = scmp.ne.s32.totalorder %s1152_s4, 0 }
  0x5c   : > { %s963_s1 = sand.u32 (!%p1159_p1), 1, %s749_s13   ;;  %p1160_p6 = scmp.ne.s32.totalorder (!%p1159_p1), %s1148_s25, 0 }
  0x5d   : > { %208 = sbr.rel (%p1159_p1) target bundleno = 163 (0xa3), region = 32  ;;  %s1141_s2 = sshll.u32 (!%p1159_p1), %s963_s1, 2 }
  0x5e   : > { %s211_s5 = scalar_lea.sflag (!%p1159_p1), [#allocation3], %s963_s1  ;;  %s214_s9 = scalar_lea.vmem (!%p1159_p1), [#allocation2], %s1141_s2 }
  0x64   : > { %728 = dma.done.wait (%p1160_p6), %s211_s5, 64  }
  0x65   : > { %730 = vsyncadd (%p1160_p6), %s211_s5, 4294967232  ;;  %p1161_p12 = scmp.ne.s32.totalorder %s1146_s23, 0 }
  0x67   : > { %732 = dma.done.wait (%p1161_p12), [#allocation5], 32  }
  0x68   : > { %734 = vsyncadd (%p1161_p12), [#allocation5], 4294967264 }
  0x69   : > { %736 = dma.done.wait (%p1161_p12), [#allocation8], 32  }
  0x6a   : > { %738 = vsyncadd (%p1161_p12), [#allocation8], 4294967264 }
  0x6b   : > { %227 = sfence }
  0x6c   : > { %s982_s17 = sshll.u32 %s761_s16, 7  ;;  %v1001_v0 = vld [vmem:[%s214_s9] sm:$0x3]  ;;  %v1010_v1 = vld [vmem:[%s214_s9 + $0x2] sm:$0x3]  ;;  %p1164_p0 = scmp.ne.s32.totalorder %s1149_s26, 0 }
  0x6d   : > { %s1142_s25 = sadd.s32 1, %s982_s17  ;;  %s250_s4 = sadd.s32 2, %s982_s17 }
  0x6e   : > { %s986_s8 = sld [smem:[#allocation6 + %s250_s4]]  ;;  %s252_s23 = sadd.s32 3, %s982_s17 }
  0x6f   : > { %s989_s24 = sld [smem:[#allocation6 + %s252_s23]]  ;;  %s254_s7 = sadd.s32 4, %s982_s17 }
  0x70   : > { %s992_s11 = sld [smem:[#allocation6 + %s254_s7]]  ;;  %s256_s22 = sadd.s32 5, %s982_s17 }
  0x71   : > { %s257_s29 = sld [smem:[#allocation6 + %s256_s22]]  ;;  %s258_s20 = sadd.s32 6, %s982_s17 }
  0x72   : > { %s259_s21 = sld [smem:[#allocation6 + %s258_s20]]  ;;  %s260_s30 = sadd.s32 7, %s982_s17 }
  0x73   : > { %s261_s6 = sld [smem:[#allocation6 + %s260_s30]]  ;;  %s262_s5 = sadd.s32 8, %s982_s17 }
  0x74   : > { %s263_s4 = sld [smem:[#allocation6 + %s262_s5]]  ;;  %v289_v3 = vstv %s986_s8  ;;  %s264_s22 = sadd.s32 9, %s982_s17 }
  0x75   : > { %s999_s2 = sld [smem:[#allocation6 + %s982_s17]]  ;;  %s268_s20 = sadd.s32 11, %s982_s17  ;;  %v299_v8 = vstv %s989_s24 }
  0x76   : > { %s1005_s23 = sld [smem:[#allocation6 + %s1142_s25]]  ;;  %s266_s30 = sadd.s32 10, %s982_s17  ;;  %v306_v12 = vstv %s992_s11 }
  0x77   : > { %s1008_s7 = sld [smem:[#allocation7 + %s982_s17]]  ;;  %v287_v2 = vstv %s257_s29  ;;  %s270_s9 = sadd.s32 12, %s982_s17 }
  0x78   : > { %v288_v4 = vmul.f32 %v287_v2, %v1001_v0  ;;  %v291_v5 = vstv %s259_s21  ;;  %s1017_s5 = sld [smem:[#allocation6 + %s268_s20]]  ;;  %s272_s25 = sadd.s32 13, %s982_s17 }
  0x79   : > { %v292_v6 = vmul.f32 %v1010_v1, %v291_v5  ;;  %v297_v7 = vstv %s261_s6  ;;  %s1025_s8 = sld [smem:[#allocation6 + %s270_s9]]  ;;  %s274_s21 = sadd.s32 14, %s982_s17 }
  0x7a   : > { %v290_v9 = vadd.f32 %v289_v3, %v288_v4  ;;  %v298_v10 = vmul.f32 %v1010_v1, %v297_v7  ;;  %v304_v11 = vstv %s263_s4  ;;  %s1027_s29 = sld [smem:[#allocation6 + %s272_s25]]  ;;  %s276_s6 = sadd.s32 15, %s982_s17 }
  0x7b   : > { %v305_v13 = vmul.f32 %v1010_v1, %v304_v11  ;;  %s275_s24 = sld [smem:[#allocation6 + %s274_s21]]  ;;  %v295_v16 = vstv %s999_s2  ;;  %s278_s4 = sadd.s32 16, %s982_s17 }
  0x7c   : > { %v293_v14 = vadd.f32 %v292_v6, %v290_v9  ;;  %v300_v15 = vadd.f32 %v299_v8, %v298_v10  ;;  %s277_s20 = sld [smem:[#allocation6 + %s276_s6]]  ;;  %s280_s11 = sadd.s32 17, %s982_s17  ;;  %v309_v20 = vstv %s1005_s23 }
  0x7d   : > { %v307_v17 = vadd.f32 %v306_v12, %v305_v13  ;;  %s279_s25 = sld [smem:[#allocation6 + %s278_s4]]  ;;  %v313_v36 = vstv %s1008_s7  ;;  %s1162_s23 = sadd.s32 1, %s982_s17 }
  0x7e   : > { %v294_v18 = vmul.f32 %v293_v14, %v1001_v0  ;;  %v301_v19 = vmul.f32 %v1010_v1, %v300_v15  ;;  %s281_s9 = sld [smem:[#allocation6 + %s280_s11]]  ;;  %v318_v26 = vstv %s1017_s5  ;;  %s1163_s7 = sshll.u32 %s963_s1, 2 }
  0x7f   : > { %v308_v21 = vmul.f32 %v1010_v1, %v307_v17  ;;  %s1041_s21 = sld [smem:[#allocation6 + %s264_s22]]  ;;  %v328_v31 = vstv %s1025_s8  ;;  %s499_s5 = sshll.u32 %s761_s16, 1 }
  0x80   : > { %v296_v22 = vadd.f32 %v295_v16, %v294_v18  ;;  %s1045_s2 = sld [smem:[#allocation6 + %s266_s30]]  ;;  %v335_v35 = vstv %s1027_s29  ;;  %s245_s30 = scalar_lea.vmem [#allocation9], %s1163_s7 }
  0x81   : > { %v310_v23 = vadd.f32 %v309_v20, %v308_v21  ;;  %v316_v25 = vstv %s275_s24  ;;  %s283_s22 = sld [smem:[#allocation7 + %s1162_s23]]  ;;  %s500_s8 = sshll.u32 %s757_s15, 2 }
  0x82   : > { %v302_v24 = vadd.f32 %v301_v19, %v296_v22  ;;  %v320_v27 = vstv %s277_s20  ;;  %v317_v29 = vmul.f32 %v316_v25, %v1001_v0  ;;  %s360_s17 = sadd.s32 %s500_s8, %s499_s5  ;;  %s363_s29 = sshll.u32 %s245_s30, 4  ;;  %s1070_s29 = int_to_ptr.vmem [resolvable:$true] %s363_s29 }
  0x83   : > { %v311_v28 = vmul.f32 %v1010_v1, %v310_v23  ;;  %v321_v30 = vmul.f32 %v1010_v1, %v320_v27  ;;  %v326_v33 = vstv %s279_s25  ;;  %s501_s6 = sshll.u32 %s360_s17, 5  ;;  %s347_s20 = scalar_lea.sflag [#allocation4], %s963_s1 }
  0x84   : > { %v303_v32 = vmul.f32 %v302_v24, %v1001_v0  ;;  %v333_v34 = vstv %s281_s9  ;;  %v319_v37 = vadd.f32 %v318_v26, %v317_v29  ;;  %v327_v38 = vmul.f32 %v1010_v1, %v326_v33  ;;  %s1075_s24 = scalar_lea.hbm %s1132_s3, %s501_s6  ;;  %s667_s4 = scalar_lea.vmem %s1070_s29, 64 }
  0x85   : > { %v334_v39 = vmul.f32 %v1010_v1, %v333_v34  ;;  %v324_v45 = vstv %s1041_s21  ;;  %p668_p13 = scmp.ne.s32.totalorder %s1070_s29, %s667_s4  ;;  %s780_s11 = smov [#allocation9]  }
  0x86   : > { %v312_v40 = vadd.f32 %v311_v28, %v303_v32  ;;  %v322_v41 = vadd.f32 %v321_v30, %v319_v37  ;;  %v329_v42 = vadd.f32 %v328_v31, %v327_v38  ;;  %v338_v46 = vstv %s1045_s2  ;;  %s671_s25 = sshll.u32 %s780_s11, 4  ;;  %s672_s25 = int_to_ptr.vmem [resolvable:$false] %s671_s25 }
  0x87   : > { %v336_v43 = vadd.f32 %v335_v35, %v334_v39  ;;  %v342_v55 = vstv %s283_s22  ;;  %p669_p4 = pnand %p668_p13, %p1164_p0  ;;  %s673_s9 = scalar_lea.vmem %s672_s25, 128 }
  0x88   : > { %v314_v44 = vadd.f32 %v313_v36, %v312_v40  ;;  %v323_v47 = vmul.f32 %v322_v41, %v1001_v0  ;;  %v330_v48 = vmul.f32 %v1010_v1, %v329_v42  ;;  %p674_p7 = scmp.lt.s32.totalorder %s1070_s29, %s672_s25  ;;  %p675_p3 = scmp.lt.s32.totalorder %s673_s9, %s667_s4 }
  0x89   : > { %v337_v49 = vmul.f32 %v1010_v1, %v336_v43  ;;  %p670_p10 = pneg %p669_p4 }
  0x8a   : > { %315 = vst [vmem:[%s245_s30] sm:$0x3] %v314_v44  ;;  %v325_v50 = vadd.f32 %v324_v45, %v323_v47  ;;  %p676_p8 = por %p675_p3, %p674_p7 }
  0x8b   : > { %v339_v51 = vadd.f32 %v338_v46, %v337_v49 }
  0x8c   : > { %v331_v52 = vadd.f32 %v330_v48, %v325_v50  ;;  %p677_p9 = pnand %p676_p8, %p670_p10 }
  0x8d   : > { %v340_v53 = vmul.f32 %v1010_v1, %v339_v51 }
  0x8e   : > { %v332_v54 = vmul.f32 %v331_v52, %v1001_v0 }
  0x90   : > { %v341_v56 = vadd.f32 %v340_v53, %v332_v54 }
  0x92   : > { %v343_v57 = vadd.f32 %v342_v55, %v341_v56 }
  0x94   : > { %497 = vst [vmem:[%s245_s30 + $0x2] sm:$0x3] %v343_v57 }
  0x95   : > { %680 = shalt.err (!%p677_p9)
}
  0x96   : > { %s681_s21 = scalar_lea.hbm %s1075_s24, 64  ;;  %s685_s22 = scalar_lea.hbm %s1132_s3, 256 }
  0x97   : > { %p682_p2 = scmp.ne.s32.totalorder %s1075_s24, %s681_s21  ;;  %p686_p1 = scmp.lt.u32.totalorder %s1075_s24, %s1132_s3 }
  0x98   : > { %p687_p6 = scmp.lt.u32.totalorder %s685_s22, %s681_s21  ;;  %p689_p13 = scmp.lt.u32.totalorder %s681_s21, %s1075_s24 }
  0x99   : > { %p683_p11 = pnand %p682_p2, %p1164_p0 }
  0x9a   : > { %p688_p12 = por %p687_p6, %p686_p1 }
  0x9b   : > { %p684_p5 = pneg %p683_p11 }
  0x9c   : > { %p690_p4 = por %p689_p13, %p688_p12 }
  0x9e   : > { %p691_p10 = pnand %p690_p4, %p684_p5 }
  0xa0   : > { %694 = shalt.err (!%p691_p10)
}
  0xa1   : > { %s781_s5 = smov 32   ;;  %s782_s8 = smov 2  }
  0xa2   : > { %514 = dma.vmem_to_hbm [thread:$0]  (%p1164_p0), %s1070_s29, 64, %s1075_s24, %s347_s20, %s781_s5, %s781_s5, %s782_s8  }
  0xa3 PF: > { %p536_p7 = scmp.ge.s32.totalorder %s773_s19, 2  ;;  %s378_s17 = sand.u32 1, %s745_s12  }
  0xa4   : > { %p1165_p3 = scmp.ne.s32.totalorder %s1150_s27, 0  ;;  %s379_s6 = scalar_lea.sflag [#allocation4], %s378_s17 }
  0xa6   : > { %p528_p8 = pnand %p536_p7, %p1165_p3 }
  0xa8   : > { %740 = dma.done.wait (!%p528_p8), %s379_s6, 64  }
  0xa9   : > { %742 = vsyncadd (!%p528_p8), %s379_s6, 4294967232  ;;  %s21_s19 = sadd.s32 1, %s773_s19   ;;  %s1166_s15 = sld [smem:[#allocation14_spill]] }
  0xaa   : > { %p18_p9 = scmp.ge.s32.totalorder %s21_s19, 6   ;;  %s1167_s17 = sld [smem:[#allocation15_spill]] }
  0xab   : > { %s1168_s12 = smov %s749_s13  ;;  %s1169_s13 = smov %s753_s14 }
  0xac   : > { %s1170_s14 = smov %s930_s10  ;;  %s1171_s16 = smov %s769_s18 }
  0xad   : > { %s1172_s18 = smov %s1178_s28  ;;  %20 = sbr.rel (!%p18_p9) target bundleno = 12 (0xc), region = 88 }
  0xb4   :  { %384 = vsyncpa [#allocation3], 1 }
  0xb5   :  { %386 = vsyncpa [#allocation3 + $0x1], 1 }
  0xb6   :  { %387 = vsyncpa [#allocation4], 1 }
  0xb7   :  { %389 = vsyncpa [#allocation4 + $0x1], 1 }
  0xb8   :  { %390 = vsyncpa [#allocation5], 1 }
  0xb9   :  { %392 = vsyncpa [#allocation5 + $0x1], 1 }
  0xba   :  { %393 = vsyncpa [#allocation8], 1 }

</bundles_post_ra>
